<compile_context>
chip_gen: v7x
topology: tpu7x:2x2x1
jax: 0.10.0
libtpu: 0.0.40
codegen_flags: <defaults>
</compile_context>

<pallas_src>
import jax
import jax.numpy as jnp
import numpy as np
from jax.experimental import pallas as pl
from jax.experimental.pallas import tpu as pltpu

# ----------------------------- small shapes ---------------------------------
B = 2            # batch_size
C = 5            # neg_pos_ratio + 1  (num candidates)
T = 8            # title_length
H = 16           # his_length
NC = 4           # num_category
D = 32           # news representation dim
V = 100          # vocab size
SCORE_WEIGHT = 0.7   # user_score_weight

LANES = max(2 * T, H, NC)          # lane width of the metadata slab (16)
META_ROWS = (C + H) + NC + C       # rows of the metadata slab (30)


# ------------------------- fused per-batch HieRec kernel ---------------------
def _hierec_kernel(x_ref, meta_ref, w_ref, o_ref):
    f32 = jnp.float32
    x = x_ref[0]            # (C+H, T, D)  token embeddings (cand rows first)
    meta = meta_ref[0]      # (META_ROWS, LANES) packed metadata
    w = w_ref[...]          # (D, D) output projection

    s = meta[:C + H, :T]                          # pre-masked attention scores
    m = meta[:C + H, T:2 * T]                     # attention mask (1.0 = keep)
    hcat_norm = meta[C + H:C + H + NC, :H]        # (NC, H) hcat / max(count,1)
    mix = meta[C + H + NC:C + H + NC + C, :NC]    # (C, NC) combined score mix

    # --- NewsEncoder: masked additive-attention pooling + projection ---------
    s = s - jnp.max(s, axis=-1, keepdims=True)
    e = jnp.exp(s) * m
    alpha = e / jnp.maximum(jnp.sum(e, axis=-1, keepdims=True), 1e-9)   # (C+H, T)
    pooled = jnp.sum(x * alpha[:, :, None], axis=1)                     # (C+H, D)
    reprs = jnp.dot(pooled, w, preferred_element_type=f32)              # (C+H, D)  MXU
    # dropout: identity (eval mode)

    cand = reprs[:C]                                                    # (C, D)
    hist = reprs[C:]                                                    # (H, D)

    # --- UserEncoder: per-category masked mean (normalisation pre-folded) ----
    cat_repr = jnp.dot(hcat_norm, hist, preferred_element_type=f32)     # (NC, D)  MXU

    # --- HieRec scoring -------------------------------------------------------
    # mix[c, n] = w_u * ccount[n] + (1 - w_u) * ratio[c] * ccat[c, n]
    # => logits[c] = sum_d cand[c, d] * (mix @ cat_repr)[c, d]
    score_vec = jnp.dot(mix, cat_repr, preferred_element_type=f32)      # (C, D)   MXU
    o_ref[0] = jnp.sum(cand * score_vec, axis=-1, keepdims=True)        # (C, 1)


# ------------------------------ wrapper / data prep --------------------------
def _pad_lanes(a, lanes):
    pad = lanes - a.shape[-1]
    if pad:
        a = jnp.pad(a, [(0, 0)] * (a.ndim - 1) + [(0, pad)])
    return a


@jax.jit
def hierec_forward(params,
                   candidate_encoding, candidate_attn_mask, candidate_category_mask,
                   history_encoding, history_attn_mask, history_category_mask,
                   candidate_category_ratio, history_category_count_mask):
    f32 = jnp.float32
    emb, q, w = params["embedding"], params["attn_query"], params["proj"]

    # --- token slab + attention-score prep (hoisted out of the kernel) -------
    tok = jnp.concatenate([candidate_encoding, history_encoding], axis=1)   # (B, C+H, T)
    msk = jnp.concatenate([candidate_attn_mask, history_attn_mask],
                          axis=1).astype(f32)                               # (B, C+H, T)

    # TODO(synk): at realistic vocab sizes this wrapper-side gather should
    # become an in-kernel scalar-prefetched DMA row gather; at V=100 jnp.take
    # in the jitted wrapper is the cheapest correct option (per perf review).
    x = jnp.take(emb, tok, axis=0)                       # (B, C+H, T, D)
    eq = emb @ q[0]                                      # (V,) per-word attention logit
    s = jnp.where(msk > 0.5, jnp.take(eq, tok), -1e9)    # (B, C+H, T) pre-masked scores

    # --- user-encoder / scoring metadata, all folding done here --------------
    hcat = history_category_mask.astype(f32)                               # (B, NC, H)
    counts = jnp.sum(hcat, axis=-1, keepdims=True)
    hcat_norm = hcat / jnp.maximum(counts, 1.0)                            # masked-mean folded
    ccount = history_category_count_mask.astype(f32)                       # (B, NC)
    ccat = candidate_category_mask.astype(f32)                             # (B, C, NC)
    ratio = candidate_category_ratio.astype(f32)                           # (B, C)
    mix = (SCORE_WEIGHT * ccount[:, None, :]
           + (1.0 - SCORE_WEIGHT) * ratio[:, :, None] * ccat)              # (B, C, NC)

    # --- pack everything non-embedding into one lane-dense f32 slab ----------
    meta = jnp.concatenate(
        [_pad_lanes(jnp.concatenate([s, msk], axis=-1), LANES),   # rows 0 .. C+H-1
         _pad_lanes(hcat_norm, LANES),                            # rows C+H .. C+H+NC-1
         _pad_lanes(mix, LANES)],                                 # rows C+H+NC .. end
        axis=1)                                                   # (B, META_ROWS, LANES)

    out = pl.pallas_call(
        _hierec_kernel,
        out_shape=jax.ShapeDtypeStruct((B, C, 1), f32),
        grid_spec=pltpu.PrefetchScalarGridSpec(
            num_scalar_prefetch=0,
            grid=(B,),
            in_specs=[
                pl.BlockSpec((1, C + H, T, D), lambda b: (b, 0, 0, 0)),
                pl.BlockSpec((1, META_ROWS, LANES), lambda b: (b, 0, 0)),
                pl.BlockSpec((D, D), lambda b: (0, 0)),
            ],
            out_specs=pl.BlockSpec((1, C, 1), lambda b: (b, 0, 0)),
        ),
        compiler_params=pltpu.CompilerParams(dimension_semantics=("parallel",)),
    )(x, meta, w)
    return out[:, :, 0]                                            # (B, C)


# ---------------------------- pure-JAX reference ----------------------------
def reference_forward(params,
                      candidate_encoding, candidate_attn_mask, candidate_category_mask,
                      history_encoding, history_attn_mask, history_category_mask,
                      candidate_category_ratio, history_category_count_mask):
    emb, q, w = params["embedding"], params["attn_query"], params["proj"]

    def encode(tok, mask):
        x = jnp.take(emb, tok, axis=0)                     # (N, T, D)
        m = mask.astype(jnp.float32)
        s = jnp.einsum("ntd,d->nt", x, q[0])
        s = jnp.where(m > 0.5, s, -1e9)
        s = s - jnp.max(s, axis=-1, keepdims=True)
        e = jnp.exp(s) * m
        a = e / jnp.maximum(jnp.sum(e, axis=-1, keepdims=True), 1e-9)
        return jnp.einsum("nt,ntd->nd", a, x) @ w

    cand_repr = encode(candidate_encoding.reshape(B * C, T),
                       candidate_attn_mask.reshape(B * C, T)).reshape(B, C, D)
    hist_repr = encode(history_encoding.reshape(B * H, T),
                       history_attn_mask.reshape(B * H, T)).reshape(B, H, D)

    hcat = history_category_mask.astype(jnp.float32)                 # (B, NC, H)
    cat_sum = jnp.einsum("bnh,bhd->bnd", hcat, hist_repr)
    counts = jnp.sum(hcat, axis=-1, keepdims=True)
    cat_repr = cat_sum / jnp.maximum(counts, 1.0)                    # (B, NC, D)
    user_repr = jnp.einsum("bn,bnd->bd",
                           history_category_count_mask.astype(jnp.float32), cat_repr)

    user_score = jnp.einsum("bcd,bd->bc", cand_repr, user_repr)
    cat_proj = jnp.einsum("bcn,bnd->bcd",
                          candidate_category_mask.astype(jnp.float32), cat_repr)
    category_score = jnp.sum(cand_repr * cat_proj, axis=-1) * candidate_category_ratio
    return SCORE_WEIGHT * user_score + (1 - SCORE_WEIGHT) * category_score


# --------------------------------- main --------------------------------------
if __name__ == "__main__":
    key = jax.random.PRNGKey(0)
    keys = jax.random.split(key, 10)

    # deterministic synthetic parameters (shapes implied by the encoders)
    params = {
        "embedding": jax.random.normal(keys[0], (V, D), jnp.float32) * 0.1,
        "attn_query": jax.random.normal(keys[1], (1, D), jnp.float32) * 0.1,
        "proj": jax.random.normal(keys[2], (D, D), jnp.float32) * 0.1,
    }

    # synthetic inputs
    candidate_encoding = jax.random.randint(keys[3], (B, C, T), 0, V, jnp.int32)
    history_encoding = jax.random.randint(keys[4], (B, H, T), 0, V, jnp.int32)

    candidate_attn_mask = jax.random.bernoulli(keys[5], 0.8, (B, C, T))
    candidate_attn_mask = candidate_attn_mask.at[..., 0].set(True)
    history_attn_mask = jax.random.bernoulli(keys[6], 0.8, (B, H, T))
    history_attn_mask = history_attn_mask.at[..., 0].set(True)

    cand_cat_ids = jax.random.randint(keys[7], (B, C), 0, NC, jnp.int32)
    candidate_category_mask = jax.nn.one_hot(cand_cat_ids, NC, dtype=jnp.float32) > 0.5

    hist_cat_ids = jax.random.randint(keys[8], (B, H), 0, NC, jnp.int32)
    history_category_mask = (
        hist_cat_ids[:, None, :] == jnp.arange(NC)[None, :, None])        # (B, NC, H)

    candidate_category_ratio = jax.random.uniform(keys[9], (B, C), jnp.float32)

    cat_counts = jnp.sum(history_category_mask.astype(jnp.float32), axis=-1)  # (B, NC)
    history_category_count_mask = cat_counts / jnp.maximum(
        jnp.sum(cat_counts, axis=-1, keepdims=True), 1.0)                     # (B, NC)

    args = (candidate_encoding, candidate_attn_mask, candidate_category_mask,
            history_encoding, history_attn_mask, history_category_mask,
            candidate_category_ratio, history_category_count_mask)

    logits = hierec_forward(params, *args)
    logits = jax.block_until_ready(logits)

    ref = reference_forward(params, *args)
    np.testing.assert_allclose(np.asarray(logits), np.asarray(ref),
                               rtol=1e-4, atol=1e-4)
    assert logits.shape == (B, C)
    print("KERNEL_OK")
</pallas_src>

<mosaic_0001>
module attributes {stable_mosaic.version = 11 : i64} {
  func.func @_hierec_kernel(%arg0: i32, %arg1: memref<1x21x8x32xf32, #tpu.memory_space<vmem>>, %arg2: memref<1x30x16xf32, #tpu.memory_space<vmem>>, %arg3: memref<32x32xf32, #tpu.memory_space<vmem>>, %arg4: memref<1x5x1xf32, #tpu.memory_space<vmem>>) attributes {dimension_semantics = [#tpu.dimension_semantics<parallel>], iteration_bounds = array<i64: 2>, scalar_prefetch = 0 : i64, scratch_operands = 0 : i64, tpu.core_type = #tpu.core_type<tc>, window_params = [{transform_indices = @transform_0, window_bounds = array<i64: 1, 21, 8, 32>}, {transform_indices = @transform_1, window_bounds = array<i64: 1, 30, 16>}, {pipeline_mode = #tpu.pipeline_mode<synchronous>, transform_indices = @transform_2, window_bounds = array<i64: 32, 32>}, {transform_indices = @transform_3, window_bounds = array<i64: 1, 5, 1>}]} {
    %c0 = arith.constant 0 : index
    %c0_0 = arith.constant 0 : index
    %c0_1 = arith.constant 0 : index
    %c0_2 = arith.constant 0 : index
    %0 = vector.load %arg1[%c0, %c0_0, %c0_1, %c0_2] : memref<1x21x8x32xf32, #tpu.memory_space<vmem>>, vector<1x21x8x32xf32>
    %1 = vector.shape_cast %0 : vector<1x21x8x32xf32> to vector<21x8x32xf32>
    %c0_3 = arith.constant 0 : index
    %c0_4 = arith.constant 0 : index
    %c0_5 = arith.constant 0 : index
    %2 = vector.load %arg2[%c0_3, %c0_4, %c0_5] : memref<1x30x16xf32, #tpu.memory_space<vmem>>, vector<1x30x16xf32>
    %3 = vector.shape_cast %2 : vector<1x30x16xf32> to vector<30x16xf32>
    %c0_6 = arith.constant 0 : index
    %c0_7 = arith.constant 0 : index
    %4 = vector.load %arg3[%c0_6, %c0_7] : memref<32x32xf32, #tpu.memory_space<vmem>>, vector<32x32xf32>
    %5 = vector.extract_strided_slice %3 {offsets = [0, 0], sizes = [21, 8], strides = [1, 1]} : vector<30x16xf32> to vector<21x8xf32>
    %6 = vector.extract_strided_slice %3 {offsets = [0, 8], sizes = [21, 8], strides = [1, 1]} : vector<30x16xf32> to vector<21x8xf32>
    %7 = vector.extract_strided_slice %3 {offsets = [21, 0], sizes = [4, 16], strides = [1, 1]} : vector<30x16xf32> to vector<4x16xf32>
    %8 = vector.extract_strided_slice %3 {offsets = [25, 0], sizes = [5, 4], strides = [1, 1]} : vector<30x16xf32> to vector<5x4xf32>
    %cst = arith.constant dense<0xFF800000> : vector<21xf32>
    %9 = vector.multi_reduction <maximumf>, %5, %cst [1] : vector<21x8xf32> to vector<21xf32>
    %10 = vector.shape_cast %9 : vector<21xf32> to vector<21x1xf32>
    %11 = vector.broadcast %10 : vector<21x1xf32> to vector<21x8xf32>
    %12 = arith.subf %5, %11 : vector<21x8xf32>
    %13 = math.exp %12 : vector<21x8xf32>
    %14 = arith.mulf %13, %6 : vector<21x8xf32>
    %cst_8 = arith.constant dense<0.000000e+00> : vector<21xf32>
    %15 = vector.multi_reduction <add>, %14, %cst_8 [1] : vector<21x8xf32> to vector<21xf32>
    %16 = vector.shape_cast %15 : vector<21xf32> to vector<21x1xf32>
    %cst_9 = arith.constant 9.99999971E-10 : f32
    %17 = vector.broadcast %cst_9 : f32 to vector<21x1xf32>
    %18 = arith.maximumf %16, %17 : vector<21x1xf32>
    %19 = vector.broadcast %18 : vector<21x1xf32> to vector<21x8xf32>
    %20 = arith.divf %14, %19 : vector<21x8xf32>
    %21 = vector.shape_cast %20 : vector<21x8xf32> to vector<21x8x1xf32>
    %22 = vector.broadcast %21 : vector<21x8x1xf32> to vector<21x8x32xf32>
    %23 = arith.mulf %1, %22 : vector<21x8x32xf32>
    %cst_10 = arith.constant dense<0.000000e+00> : vector<21x32xf32>
    %24 = vector.multi_reduction <add>, %23, %cst_10 [1] : vector<21x8x32xf32> to vector<21x32xf32>
    %cst_11 = arith.constant dense<0.000000e+00> : vector<21x32xf32>
    %25 = tpu.matmul %24, %4, %cst_11 {dimension_numbers = #tpu.dot_dimension_numbers<[1], [0], [0], [1], [0, 0, 1, 1], [], []>} : vector<21x32xf32>, vector<32x32xf32>, vector<21x32xf32> -> vector<21x32xf32>
    %26 = vector.extract_strided_slice %25 {offsets = [0, 0], sizes = [5, 32], strides = [1, 1]} : vector<21x32xf32> to vector<5x32xf32>
    %27 = vector.extract_strided_slice %25 {offsets = [5, 0], sizes = [16, 32], strides = [1, 1]} : vector<21x32xf32> to vector<16x32xf32>
    %cst_12 = arith.constant dense<0.000000e+00> : vector<4x32xf32>
    %28 = tpu.matmul %7, %27, %cst_12 {dimension_numbers = #tpu.dot_dimension_numbers<[1], [0], [0], [1], [0, 0, 1, 1], [], []>} : vector<4x16xf32>, vector<16x32xf32>, vector<4x32xf32> -> vector<4x32xf32>
    %cst_13 = arith.constant dense<0.000000e+00> : vector<5x32xf32>
    %29 = tpu.matmul %8, %28, %cst_13 {dimension_numbers = #tpu.dot_dimension_numbers<[1], [0], [0], [1], [0, 0, 1, 1], [], []>} : vector<5x4xf32>, vector<4x32xf32>, vector<5x32xf32> -> vector<5x32xf32>
    %30 = arith.mulf %26, %29 : vector<5x32xf32>
    %cst_14 = arith.constant dense<0.000000e+00> : vector<5xf32>
    %31 = vector.multi_reduction <add>, %30, %cst_14 [1] : vector<5x32xf32> to vector<5xf32>
    %32 = vector.shape_cast %31 : vector<5xf32> to vector<5x1xf32>
    %c0_15 = arith.constant 0 : index
    %c0_16 = arith.constant 0 : index
    %c0_17 = arith.constant 0 : index
    %33 = vector.load %arg4[%c0_15, %c0_16, %c0_17] : memref<1x5x1xf32, #tpu.memory_space<vmem>>, vector<1x5x1xf32>
    %34 = vector.shape_cast %33 : vector<1x5x1xf32> to vector<5x1xf32>
    %35 = vector.shape_cast %32 : vector<5x1xf32> to vector<1x5x1xf32>
    tpu.vector_store %arg4[%c0_15, %c0_16, %c0_17], %35 {strides = array<i32>} : memref<1x5x1xf32, #tpu.memory_space<vmem>>, vector<1x5x1xf32>,
    return
  }
  func.func @transform_0(%arg0: i32) -> (i32, i32, i32, i32) {
    %c0_i32 = arith.constant 0 : i32
    %c0_i32_0 = arith.constant 0 : i32
    %c0_i32_1 = arith.constant 0 : i32
    %c0_i32_2 = arith.constant 0 : i32
    return %arg0, %c0_i32, %c0_i32_0, %c0_i32_1 : i32, i32, i32, i32
  }
  func.func @transform_1(%arg0: i32) -> (i32, i32, i32) {
    %c0_i32 = arith.constant 0 : i32
    %c0_i32_0 = arith.constant 0 : i32
    %c0_i32_1 = arith.constant 0 : i32
    return %arg0, %c0_i32, %c0_i32_0 : i32, i32, i32
  }
  func.func @transform_2(%arg0: i32) -> (i32, i32) {
    %c0_i32 = arith.constant 0 : i32
    %c0_i32_0 = arith.constant 0 : i32
    %c0_i32_1 = arith.constant 0 : i32
    return %c0_i32, %c0_i32_0 : i32, i32
  }
  func.func @transform_3(%arg0: i32) -> (i32, i32, i32) {
    %c0_i32 = arith.constant 0 : i32
    %c0_i32_0 = arith.constant 0 : i32
    %c0_i32_1 = arith.constant 0 : i32
    return %arg0, %c0_i32, %c0_i32_0 : i32, i32, i32
  }
}

</mosaic_0001>

<bundles_post_ra>
// kernel: hierec_forward.1
= control target key start
LH: loop header
LB: loop body
LE: loop exit
PB: predicated region body
PF: predicated region fallthrough
CT: control target
= control target key end

     0   :  { %s1082_s12 = smov 0   ;;  %s1236_s0 = inlined_call_operand.vmem [shape: f32[2,21,8,32], index: 0, kind: input, shape index: {}]   ;;  %s1237_s1 = inlined_call_operand.vmem [shape: f32[2,30,16], index: 1, kind: input, shape index: {}]   ;;  %s1238_s2 = inlined_call_operand.vmem [shape: f32[32,32], index: 2, kind: input, shape index: {}]   ;;  %s1239_s3 = inlined_call_operand.vmem [shape: f32[2,5,1], index: 3, kind: output, shape index: {}]  }
   0x1 LB: > { %s957_s13 = sadd.s32 4294967295, %s1056_s12   ;;  %p961_p0 = scmp.ge.s32.totalorder %s1056_s12, 1  ;;  %s1056_s12 = sphi %s1082_s12, %s13_s12  }
   0x2   : > { %p147_p1 = scmp.lt.s32.totalorder %s1056_s12, 3 }
   0x4   : > { %p148_p2 = pnand %p961_p0, %p147_p1 }
   0x5   : > { %p175_p3 = scmp.lt.s32.totalorder (!%p148_p2), %s957_s13, 1  ;;  %vm218_vm0 = vcmask (!%p148_p2), 64512   ;;  %vm225_vm1 = vcmask (!%p148_p2), 61440   ;;  %s1058_s18 = smov (!%p148_p2), 120   ;;  %v271_v30 = vlaneseq (!%p148_p2)  ;;  %v214_v60 = vld [vmem:[%s1238_s2] sm:$0xff] (!%p148_p2)  ;;  %vm1060_vm2 = vmmov (!%p148_p2), 0  }
   0x6   : > { %151 = sbr.rel (%p148_p2) target bundleno = 1303 (0x517), region = 32  ;;  %vm439_vm3 = vcmask (!%p148_p2), 261120   ;;  %vm608_vm4 = vcmask (!%p148_p2), 1041409   ;;  %vm610_vm5 = vcmask (!%p148_p2), 1042434   ;;  %vm612_vm6 = vcmask (!%p148_p2), 1043459  }
   0x7   : > { %v1112_v32 = vshrl.u32 (!%p148_p2), %v271_v30, 7  ;;  %vm614_vm7 = vcmask (!%p148_p2), 1044484   ;;  %vm616_vm8 = vcmask (!%p148_p2), 1045509   ;;  %vm618_vm9 = vcmask (!%p148_p2), 1046534  }
   0x8   : > { %vm620_vm10 = vcmask (!%p148_p2), 1047559   ;;  %vm720_vm11 = vcmask (!%p148_p2), 1042432   ;;  %vm734_vm12 = vcmask (!%p148_p2), 130048   ;;  %vm811_vm13 = vcmask (!%p148_p2), 1043456  }
   0x9   : > { %v1115_v33 = vsub.s32 (!%p148_p2), 0, %v1112_v32  ;;  %v280_v34 = vsub.s32 (!%p148_p2), 1, %v1112_v32  ;;  %v1120_v39 = vsub.s32 (!%p148_p2), 2, %v1112_v32  ;;  %v308_v40 = vsub.s32 (!%p148_p2), 5, %v1112_v32 }
   0xa   : > { %v294_v46 = vsub.s32 (!%p148_p2), 3, %v1112_v32  ;;  %v301_v50 = vsub.s32 (!%p148_p2), 4, %v1112_v32  ;;  %v315_v55 = vsub.s32 (!%p148_p2), 6, %v1112_v32  ;;  %v322_v58 = vsub.s32 (!%p148_p2), 7, %v1112_v32 }
   0xb   : > { %vm808_vm14 = vcmask (!%p148_p2), 31744   ;;  %vm886_vm15 = vcmask (!%p148_p2), 258048  }
   0xd   : > { %s1241_s13 = smov (!%p175_p3, %s957_s13), 1 }
   0xe   : > { %s974_s14 = sshll.u32 %s1241_s13, 5  ;;  %s1025_s27 = smul.u32 168, %s1241_s13 }
   0xf   : > { %s1096_s17 = scalar_lea.vmem %s1237_s1, %s974_s14  ;;  %s965_s4 = sshll.u32 %s1241_s13, 3 }
  0x10   : > { %v210_v0 = vld [vmem:[%s1096_s17] sm:$0xff]  ;;  %v211_v1 = vld [vmem:[%s1096_s17 + $0x8] sm:$0xff]  ;;  %v1101_v2 = vld [vmem:[%s1096_s17 + $0x10] sm:$0xff]  ;;  %s1152_s30 = scalar_lea.vmem %s1236_s0, %s1025_s27  ;;  %s188_s7 = scalar_lea.vmem %s1239_s3, %s965_s4 }
  0x11   : > { %v219_v3 = vsel %vm218_vm0, %v210_v0, -inf  ;;  %v226_v4 = vsel %vm225_vm1, %v1101_v2, -inf  ;;  %v222_v5 = vsel %vm218_vm0, %v211_v1, -inf }
  0x12   : > { %220 = vmax.xlane.f32.xlu0 %v219_v3  ;;  %227 = vmax.xlane.f32.xlu1 %v226_v4  ;;  %v216_v4 = vld [vmem:[%s1238_s2 + $0x10] sm:$0xff] }
  0x16   : > { %223 = vmax.xlane.f32.xlu0 %v222_v5  ;;  %v217_v5 = vld [vmem:[%s1238_s2 + $0x18] sm:$0xff] }
  0x23   : > { %241 = vrot.lane.b32.xlu1 %v210_v0, %s1058_s18 }
  0x27   : > { %245 = vrot.lane.b32.xlu1 %v1101_v2, %s1058_s18 }
  0x2c   : > { %243 = vrot.lane.b32.xlu0 %v211_v1, %s1058_s18 }
  0x9f   : > { %v221_v6 = vpop.xlane.xlu0 %220  ;;  %v228_v7 = vpop.xlane.xlu1 %227 }
  0xa0   : > { %v229_v8 = vsub.f32 %v210_v0, %v221_v6  ;;  %v231_v9 = vsub.f32 %v1101_v2, %v228_v7  ;;  %v215_v0 = vld [vmem:[%s1238_s2 + $0x8] sm:$0xff] }
  0xa1   : > { %v1017_v3 = vpack.c.bf16 %v215_v0, %v214_v60 }
  0xa2   : > { %v232_v10 = vmul.f32 1.442695, %v229_v8  ;;  %v236_v11 = vmul.f32 1.442695, %v231_v9  ;;  %v1020_v8 = vpack.c.bf16 %v217_v5, %v216_v4  ;;  %v200_v5 = vld [vmem:[%s1152_s30 + $0x58] sm:$0xff] }
  0xa3   : > { %v224_v12 = vpop.xlane.xlu0 %223  ;;  %v242_v15 = vpop.permute.xlu1 %241 }
  0xa4   : > { %1038 = vpow2.f32 %v232_v10  ;;  %v230_v13 = vsub.f32 %v211_v1, %v224_v12  ;;  %v1059_v1 = vmov 0.0|0.0  }
  0xa5   : > { %1040 = vpow2.f32 %v236_v11  ;;  %1016 = vmatprep.subr.bf16.mxu0 %v1059_v1  ;;  %1022 = vmatprep.subr.bf16.mxu1 %v1059_v1  ;;  %v1061_v11 = vmov 0.0  }
  0xa6   : > { %v234_v14 = vmul.f32 1.442695, %v230_v13  ;;  %1018 = vmatpush3.bf16.msra.mxu0 %v1017_v3  ;;  %995 = vmatprep.mubr.msk.f32.mxu0 %vm1060_vm2, %v1061_v11 }
  0xa7   : > { %v244_v19 = vpop.permute.xlu0 %243  ;;  %v246_v20 = vpop.permute.xlu1 %245  ;;  %1019 = vmatprep.subr.bf16.mxu0 %v1059_v1  ;;  %1008 = vmatprep.mubr.msk.f32.mxu1 %vm1060_vm2, %v1061_v11 }
  0xa8   : > { %1042 = vpow2.f32 %v234_v14 }
  0xaa   : > { %1021 = vmatpush3.bf16.msra.mxu0 %v1020_v8 }
  0xae   : > { %v1039_v16 = vpop.eup %1038 }
  0xaf   : > { %v250_v17 = vmul.f32 %v1039_v16, %v242_v15  ;;  %v1041_v18 = vpop.eup %1040  ;;  %v189_v15 = vld [vmem:[%s1152_s30] sm:$0xff]  ;;  %v190_v16 = vld [vmem:[%s1152_s30 + $0x8] sm:$0xff] }
  0xb0   : > { %v252_v24 = vmul.f32 %v1041_v18, %v246_v20 }
  0xb1   : > { %v253_v21 = vsel %vm218_vm0, %v250_v17, 0.0 }
  0xb2   : > { %v1043_v22 = vpop.eup %1042  ;;  %254 = vadd.xlane.f32.xlu1 %v253_v21  ;;  %v259_v26 = vsel %vm225_vm1, %v252_v24, 0.0  ;;  %v191_v21 = vld [vmem:[%s1152_s30 + $0x10] sm:$0xff] }
  0xb3   : > { %v251_v23 = vmul.f32 %v1043_v22, %v244_v19  ;;  %v194_v22 = vld [vmem:[%s1152_s30 + $0x28] sm:$0xff] }
  0xb5   : > { %v256_v25 = vsel %vm218_vm0, %v251_v23, 0.0  ;;  %vm890_vm0 = vcmask 4096  }
  0xb6   : > { %257 = vadd.xlane.f32.xlu0 %v256_v25 }
  0xba   : > { %260 = vadd.xlane.f32.xlu0 %v259_v26 }
 0x13f   : > { %v255_v27 = vpop.xlane.xlu1 %254 }
 0x140   : > { %v262_v28 = vmax.f32 %v255_v27, 1e-09 }
 0x142   : > { %1044 = vrcp.f32 %v262_v28 }
 0x143   : > { %v258_v29 = vpop.xlane.xlu0 %257 }
 0x144   : > { %v263_v31 = vmax.f32 %v258_v29, 1e-09 }
 0x146   : > { %1046 = vrcp.f32 %v263_v31 }
 0x147   : > { %v261_v43 = vpop.xlane.xlu0 %260 }
 0x148   : > { %v264_v47 = vmax.f32 %v261_v43, 1e-09 }
 0x14a   : > { %1048 = vrcp.f32 %v264_v47 }
 0x14c   : > { %v1045_v35 = vpop.eup %1044 }
 0x14d   : > { %v266_v36 = vmul.f32 %v1045_v35, %v250_v17 }
 0x14f   : > { %v274_v37 = vrot.slane %v266_v36, %v1115_v33  ;;  %v281_v38 = vrot.slane %v266_v36, %v280_v34  ;;  %v288_v44 = vrot.slane %v266_v36, %v1120_v39  ;;  %v309_v45 = vrot.slane %v266_v36, %v308_v40 }
 0x150   : > { %v1047_v41 = vpop.eup %1046  ;;  %v295_v48 = vrot.slane %v266_v36, %v294_v46  ;;  %v302_v51 = vrot.slane %v266_v36, %v301_v50  ;;  %v316_v57 = vrot.slane %v266_v36, %v315_v55  ;;  %v323_v63 = vrot.slane %v266_v36, %v322_v58 }
 0x151   : > { %276 = vbcast.lane.b32.xlu1 %v274_v37, 256  ;;  %283 = vbcast.lane.b32.xlu0 %v281_v38, 256  ;;  %v268_v42 = vmul.f32 %v1047_v41, %v251_v23 }
 0x153   : > { %v337_v49 = vrot.slane %v268_v42, %v280_v34  ;;  %v344_v52 = vrot.slane %v268_v42, %v1120_v39  ;;  %v351_v53 = vrot.slane %v268_v42, %v294_v46  ;;  %v330_v54 = vrot.slane %v268_v42, %v1115_v33 }
 0x154   : > { %v365_v56 = vrot.slane %v268_v42, %v308_v40  ;;  %v1049_v59 = vpop.eup %1048  ;;  %v379_v62 = vrot.slane %v268_v42, %v322_v58  ;;  %v358_v6 = vrot.slane %v268_v42, %v301_v50  ;;  %v372_v9 = vrot.slane %v268_v42, %v315_v55 }
 0x155   : > { %290 = vbcast.lane.b32.xlu1 %v288_v44, 256  ;;  %311 = vbcast.lane.b32.xlu0 %v309_v45, 256  ;;  %v270_v61 = vmul.f32 %v1049_v59, %v252_v24 }
 0x157   : > { %v393_v7 = vrot.slane %v270_v61, %v280_v34  ;;  %v407_v10 = vrot.slane %v270_v61, %v294_v46  ;;  %v386_v12 = vrot.slane %v270_v61, %v1115_v33  ;;  %v400_v13 = vrot.slane %v270_v61, %v1120_v39  ;;  %v192_v33 = vld [vmem:[%s1152_s30 + $0x18] sm:$0xff]  ;;  %v198_v34 = vld [vmem:[%s1152_s30 + $0x48] sm:$0xff] }
 0x158   : > { %v414_v14 = vrot.slane %v270_v61, %v301_v50 }
 0x159   : > { %297 = vbcast.lane.b32.xlu1 %v295_v48, 256  ;;  %339 = vbcast.lane.b32.xlu0 %v337_v49, 256  ;;  %v193_v48 = vld [vmem:[%s1152_s30 + $0x20] sm:$0xff]  ;;  %v199_v49 = vld [vmem:[%s1152_s30 + $0x50] sm:$0xff] }
 0x15d   : > { %304 = vbcast.lane.b32.xlu1 %v302_v51, 256  ;;  %346 = vbcast.lane.b32.xlu0 %v344_v52, 256 }
 0x161   : > { %353 = vbcast.lane.b32.xlu0 %v351_v53, 256  ;;  %332 = vbcast.lane.b32.xlu1 %v330_v54, 256 }
 0x165   : > { %367 = vbcast.lane.b32.xlu0 %v365_v56, 256  ;;  %318 = vbcast.lane.b32.xlu1 %v316_v57, 256 }
 0x169   : > { %381 = vbcast.lane.b32.xlu0 %v379_v62, 256  ;;  %325 = vbcast.lane.b32.xlu1 %v323_v63, 256  ;;  %v197_v63 = vld [vmem:[%s1152_s30 + $0x40] sm:$0xff] }
 0x16d   : > { %360 = vbcast.lane.b32.xlu1 %v358_v6, 256  ;;  %395 = vbcast.lane.b32.xlu0 %v393_v7, 256 }
 0x171   : > { %374 = vbcast.lane.b32.xlu1 %v372_v9, 256  ;;  %409 = vbcast.lane.b32.xlu0 %v407_v10, 256 }
 0x175   : > { %388 = vbcast.lane.b32.xlu1 %v386_v12, 256 }
 0x179   : > { %402 = vbcast.lane.b32.xlu1 %v400_v13, 256 }
 0x17d   : > { %416 = vbcast.lane.b32.xlu1 %v414_v14, 256 }
 0x1c3   : > { %v277_v17 = vpop.permute.xlu1 %276  ;;  %v284_v18 = vpop.permute.xlu0 %283 }
 0x1c4   : > { %v418_v19 = vmul.f32 %v277_v17, %v189_v15  ;;  %v419_v20 = vmul.f32 %v284_v18, %v190_v16 }
 0x1c6   : > { %v440_v23 = vsel %vm439_vm3, %v418_v19, 0.0  ;;  %v447_v24 = vsel %vm439_vm3, %v419_v20, 0.0 }
 0x1c7   : > { %v441_v25 = vrot.slane %v440_v23, 4  ;;  %v448_v26 = vrot.slane %v447_v24, 4  ;;  %v291_v27 = vpop.permute.xlu1 %290  ;;  %v312_v28 = vpop.permute.xlu0 %311 }
 0x1c8   : > { %v420_v29 = vmul.f32 %v291_v27, %v191_v21  ;;  %v423_v30 = vmul.f32 %v312_v28, %v194_v22  ;;  %v195_v22 = vld [vmem:[%s1152_s30 + $0x30] sm:$0xff] }
 0x1c9   : > { %v442_v31 = vadd.f32 %v441_v25, %v440_v23  ;;  %v449_v32 = vadd.f32 %v448_v26, %v447_v24  ;;  %v202_v23 = vld [vmem:[%s1152_s30 + $0x68] sm:$0xff] }
 0x1ca   : > { %v454_v35 = vsel %vm439_vm3, %v420_v29, 0.0  ;;  %v475_v36 = vsel %vm439_vm3, %v423_v30, 0.0 }
 0x1cb   : > { %v443_v37 = vrot.slane %v442_v31, 2  ;;  %v450_v38 = vrot.slane %v449_v32, 2  ;;  %v455_v39 = vrot.slane %v454_v35, 4  ;;  %v476_v40 = vrot.slane %v475_v36, 4  ;;  %v298_v41 = vpop.permute.xlu1 %297  ;;  %v340_v42 = vpop.permute.xlu0 %339 }
 0x1cc   : > { %v421_v43 = vmul.f32 %v298_v41, %v192_v33  ;;  %v427_v44 = vmul.f32 %v340_v42, %v198_v34  ;;  %v196_v41 = vld [vmem:[%s1152_s30 + $0x38] sm:$0xff] }
 0x1cd   : > { %v444_v45 = vadd.f32 %v443_v37, %v442_v31  ;;  %v456_v46 = vadd.f32 %v455_v39, %v454_v35  ;;  %v477_v47 = vadd.f32 %v476_v40, %v475_v36  ;;  %v451_v52 = vadd.f32 %v450_v38, %v449_v32 }
 0x1ce   : > { %v461_v50 = vsel %vm439_vm3, %v421_v43, 0.0  ;;  %v503_v51 = vsel %vm439_vm3, %v427_v44, 0.0 }
 0x1cf   : > { %v457_v53 = vrot.slane %v456_v46, 2  ;;  %v478_v54 = vrot.slane %v477_v47, 2  ;;  %v305_v55 = vpop.permute.xlu1 %304  ;;  %v347_v56 = vpop.permute.xlu0 %346  ;;  %v462_v57 = vrot.slane %v461_v50, 4  ;;  %v504_v58 = vrot.slane %v503_v51, 4 }
 0x1d0   : > { %v422_v59 = vmul.f32 %v305_v55, %v193_v48  ;;  %v428_v60 = vmul.f32 %v347_v56, %v199_v49  ;;  %v445_v61 = vrot.slane %v444_v45, 1  ;;  %v452_v6 = vrot.slane %v451_v52, 1  ;;  %v204_v48 = vld [vmem:[%s1152_s30 + $0x78] sm:$0xff] }
 0x1d1   : > { %v458_v62 = vadd.f32 %v457_v53, %v456_v46  ;;  %v463_v0 = vadd.f32 %v462_v57, %v461_v50  ;;  %v505_v1 = vadd.f32 %v504_v58, %v503_v51  ;;  %v479_v10 = vadd.f32 %v478_v54, %v477_v47 }
 0x1d2   : > { %v468_v3 = vsel %vm439_vm3, %v422_v59, 0.0  ;;  %v510_v4 = vsel %vm439_vm3, %v428_v60, 0.0  ;;  %v446_v15 = vadd.f32 %v445_v61, %v444_v45  ;;  %v453_v30 = vadd.f32 %v452_v6, %v451_v52  ;;  %v201_v61 = vld [vmem:[%s1152_s30 + $0x60] sm:$0xff] }
 0x1d3   : > { %v469_v7 = vrot.slane %v468_v3, 4  ;;  %v333_v8 = vpop.permute.xlu1 %332  ;;  %v354_v9 = vpop.permute.xlu0 %353  ;;  %v464_v12 = vrot.slane %v463_v0, 2  ;;  %v511_v13 = vrot.slane %v510_v4, 4  ;;  %v459_v18 = vrot.slane %v458_v62, 1 }
 0x1d4   : > { %v426_v14 = vmul.f32 %v333_v8, %v197_v63  ;;  %v429_v17 = vmul.f32 %v354_v9, %v200_v5  ;;  %v506_v19 = vrot.slane %v505_v1, 2  ;;  %v480_v31 = vrot.slane %v479_v10, 1  ;;  %v206_v5 = vld [vmem:[%s1152_s30 + $0x88] sm:$0xff] }
 0x1d5   : > { %v470_v16 = vadd.f32 %v469_v7, %v468_v3  ;;  %v512_v20 = vadd.f32 %v511_v13, %v510_v4  ;;  %v465_v24 = vadd.f32 %v464_v12, %v463_v0  ;;  %v460_v38 = vadd.f32 %v459_v18, %v458_v62 }
 0x1d6   : > { %v496_v21 = vsel %vm439_vm3, %v426_v14, 0.0  ;;  %v517_v27 = vsel %vm439_vm3, %v429_v17, 0.0  ;;  %v507_v39 = vadd.f32 %v506_v19, %v505_v1  ;;  %v609_v49 = vsel %vm608_vm4, %v453_v30, %v446_v15  ;;  %v208_v30 = vld [vmem:[%s1152_s30 + $0x98] sm:$0xff] }
 0x1d7   : > { %v471_v25 = vrot.slane %v470_v16, 2  ;;  %v497_v26 = vrot.slane %v496_v21, 4  ;;  %v319_v28 = vpop.permute.xlu1 %318  ;;  %v368_v29 = vpop.permute.xlu0 %367  ;;  %v513_v32 = vrot.slane %v512_v20, 2  ;;  %v518_v33 = vrot.slane %v517_v27, 4 }
 0x1d8   : > { %v424_v36 = vmul.f32 %v319_v28, %v195_v22  ;;  %v431_v37 = vmul.f32 %v368_v29, %v202_v23  ;;  %v466_v42 = vrot.slane %v465_v24, 1  ;;  %v1181_v50 = vadd.f32 %v480_v31, %v479_v10  ;;  %v203_v28 = vld [vmem:[%s1152_s30 + $0x70] sm:$0xff] }
 0x1d9   : > { %v472_v34 = vadd.f32 %v471_v25, %v470_v16  ;;  %v498_v35 = vadd.f32 %v497_v26, %v496_v21  ;;  %v519_v40 = vadd.f32 %v518_v33, %v517_v27  ;;  %v514_v51 = vadd.f32 %v513_v32, %v512_v20 }
 0x1da   : > { %v482_v44 = vsel %vm439_vm3, %v424_v36, 0.0  ;;  %v531_v45 = vsel %vm439_vm3, %v431_v37, 0.0  ;;  %v611_v57 = vsel %vm610_vm5, %v460_v38, %v609_v49  ;;  %v467_v62 = vadd.f32 %v466_v42, %v465_v24 }
 0x1db   : > { %v499_v43 = vrot.slane %v498_v35, 2  ;;  %v326_v46 = vpop.permute.xlu1 %325  ;;  %v382_v47 = vpop.permute.xlu0 %381  ;;  %v483_v52 = vrot.slane %v482_v44, 4  ;;  %v473_v53 = vrot.slane %v472_v34, 1  ;;  %v532_v55 = vrot.slane %v531_v45, 4 }
 0x1dc   : > { %v425_v56 = vmul.f32 %v326_v46, %v196_v41  ;;  %v520_v58 = vrot.slane %v519_v40, 2  ;;  %v433_v60 = vmul.f32 %v382_v47, %v204_v48  ;;  %v508_v63 = vrot.slane %v507_v39, 1 }
 0x1dd   : > { %v500_v54 = vadd.f32 %v499_v43, %v498_v35  ;;  %v484_v59 = vadd.f32 %v483_v52, %v482_v44  ;;  %v515_v6 = vrot.slane %v514_v51, 1  ;;  %v474_v10 = vadd.f32 %v473_v53, %v472_v34  ;;  %v205_v34 = vld [vmem:[%s1152_s30 + $0x80] sm:$0xff] }
 0x1de   : > { %v489_v1 = vsel %vm439_vm3, %v425_v56, 0.0  ;;  %v545_v9 = vsel %vm439_vm3, %v433_v60, 0.0  ;;  %v533_v12 = vadd.f32 %v532_v55, %v531_v45  ;;  %v521_v15 = vadd.f32 %v520_v58, %v519_v40  ;;  %v207_v58 = vld [vmem:[%s1152_s30 + $0x90] sm:$0xff] }
 0x1df   : > { %v501_v0 = vrot.slane %v500_v54, 1  ;;  %v361_v3 = vpop.permute.xlu1 %360  ;;  %v396_v4 = vpop.permute.xlu0 %395  ;;  %v485_v7 = vrot.slane %v484_v59, 2  ;;  %v490_v8 = vrot.slane %v489_v1, 4  ;;  %v546_v13 = vrot.slane %v545_v9, 4 }
 0x1e0   : > { %v430_v14 = vmul.f32 %v361_v3, %v201_v61  ;;  %v435_v18 = vmul.f32 %v396_v4, %v206_v5  ;;  %v509_v19 = vadd.f32 %v508_v63, %v507_v39  ;;  %v613_v24 = vsel %vm612_vm6, %v467_v62, %v611_v57 }
 0x1e1   : > { %v486_v16 = vadd.f32 %v485_v7, %v484_v59  ;;  %v491_v17 = vadd.f32 %v490_v8, %v489_v1  ;;  %v502_v20 = vadd.f32 %v501_v0, %v500_v54  ;;  %v547_v21 = vadd.f32 %v546_v13, %v545_v9 }
 0x1e2   : > { %v524_v22 = vsel %vm439_vm3, %v430_v14, 0.0  ;;  %v516_v31 = vadd.f32 %v515_v6, %v514_v51  ;;  %v534_v32 = vrot.slane %v533_v12, 2  ;;  %v559_v33 = vsel %vm439_vm3, %v435_v18, 0.0  ;;  %v209_v14 = vld [vmem:[%s1152_s30 + $0xa0] sm:$0xff] }
 0x1e3   : > { %v375_v23 = vpop.permute.xlu1 %374  ;;  %v487_v25 = vrot.slane %v486_v16, 1  ;;  %v492_v26 = vrot.slane %v491_v17, 2  ;;  %v525_v27 = vrot.slane %v524_v22, 4  ;;  %v410_v29 = vpop.permute.xlu0 %409  ;;  %v615_v35 = vsel %vm614_vm7, %v474_v10, %v613_v24 }
 0x1e4   : > { %v522_v36 = vrot.slane %v521_v15, 1  ;;  %v560_v39 = vrot.slane %v559_v33, 4  ;;  %v622_v40 = vsel %vm608_vm4, %v509_v19, %v502_v20  ;;  %v548_v41 = vrot.slane %v547_v21, 2 }
 0x1e5   : > { %v493_v37 = vadd.f32 %v492_v26, %v491_v17  ;;  %v526_v38 = vadd.f32 %v525_v27, %v524_v22  ;;  %v432_v42 = vmul.f32 %v375_v23, %v203_v28  ;;  %v437_v43 = vmul.f32 %v410_v29, %v208_v30 }
 0x1e6   : > { %v488_v45 = vadd.f32 %v487_v25, %v486_v16  ;;  %v535_v49 = vadd.f32 %v534_v32, %v533_v12  ;;  %v561_v51 = vadd.f32 %v560_v39, %v559_v33  ;;  %v623_v54 = vsel %vm610_vm5, %v516_v31, %v622_v40 }
 0x1e7   : > { %v389_v44 = vpop.permute.xlu1 %388  ;;  %v494_v46 = vrot.slane %v493_v37, 1  ;;  %v527_v47 = vrot.slane %v526_v38, 2  ;;  %v538_v52 = vsel %vm439_vm3, %v432_v42, 0.0  ;;  %v573_v53 = vsel %vm439_vm3, %v437_v43, 0.0 }
 0x1e8   : > { %v434_v48 = vmul.f32 %v389_v44, %v205_v34  ;;  %v539_v57 = vrot.slane %v538_v52, 4  ;;  %v549_v59 = vadd.f32 %v548_v41, %v547_v21  ;;  %v574_v60 = vrot.slane %v573_v53, 4 }
 0x1e9   : > { %v495_v55 = vadd.f32 %v494_v46, %v493_v37  ;;  %v528_v56 = vadd.f32 %v527_v47, %v526_v38  ;;  %v617_v63 = vsel %vm616_vm8, %v1181_v50, %v615_v35  ;;  %v562_v5 = vrot.slane %v561_v51, 2 }
 0x1ea   : > { %v552_v61 = vsel %vm439_vm3, %v434_v48, 0.0  ;;  %v540_v1 = vadd.f32 %v539_v57, %v538_v52  ;;  %v619_v4 = vsel %vm618_vm9, %v488_v45, %v617_v63  ;;  %v575_v6 = vadd.f32 %v574_v60, %v573_v53 }
 0x1eb   : > { %v403_v62 = vpop.permute.xlu1 %402  ;;  %v529_v0 = vrot.slane %v528_v56, 1  ;;  %v553_v3 = vrot.slane %v552_v61, 4  ;;  %v621_v8 = vsel %vm620_vm10, %v495_v55, %v619_v4  ;;  %v523_v9 = vadd.f32 %v522_v36, %v521_v15 }
 0x1ec   : > { %v436_v7 = vmul.f32 %v403_v62, %v207_v58  ;;  %v541_v12 = vrot.slane %v540_v1, 2  ;;  %996 = vmatmul.mubr.msk.f32.vlgmr.msra.gmra.mrb[0].mxu0 %vm439_vm3, %v621_v8  ;;  %v536_v16 = vrot.slane %v535_v49, 1  ;;  %v550_v22 = vrot.slane %v549_v59, 1 }
 0x1ed   : > { %v530_v10 = vadd.f32 %v529_v0, %v528_v56  ;;  %v554_v13 = vadd.f32 %v553_v3, %v552_v61  ;;  %998 = vmatprep.mubr.msk.f32.mxu0 %vm1060_vm2, %v1061_v11  ;;  %v624_v18 = vsel %vm612_vm6, %v523_v9, %v623_v54  ;;  %v563_v15 = vadd.f32 %v562_v5, %v561_v51 }
 0x1ee   : > { %v566_v50 = vsel %vm439_vm3, %v436_v7, 0.0  ;;  %v542_v19 = vadd.f32 %v541_v12, %v540_v1  ;;  %v576_v23 = vrot.slane %v575_v6, 2  ;;  %v537_v29 = vadd.f32 %v536_v16, %v535_v49  ;;  %v213_v1 = vld [vmem:[%s1096_s17 + $0x18] sm:$0x3f] }
 0x1ef   : > { %v417_v17 = vpop.permute.xlu1 %416  ;;  %v555_v20 = vrot.slane %v554_v13, 2  ;;  %v567_v21 = vrot.slane %v566_v50, 4  ;;  %v625_v28 = vsel %vm614_vm7, %v530_v10, %v624_v18  ;;  %v551_v35 = vadd.f32 %v550_v22, %v549_v59 }
 0x1f0   : > { %v438_v24 = vmul.f32 %v417_v17, %v209_v14  ;;  %v543_v25 = vrot.slane %v542_v19, 1  ;;  %v564_v36 = vrot.slane %v563_v15, 1  ;;  %v577_v37 = vadd.f32 %v576_v23, %v575_v6 }
 0x1f1   : > { %v556_v26 = vadd.f32 %v555_v20, %v554_v13  ;;  %v568_v27 = vadd.f32 %v567_v21, %v566_v50  ;;  %v626_v38 = vsel %vm616_vm8, %v537_v29, %v625_v28  ;;  %v721_v6 = vrot.slane %v1101_v2, 5 }
 0x1f2   : > { %v580_v30 = vsel %vm439_vm3, %v438_v24, 0.0  ;;  %v544_v31 = vadd.f32 %v543_v25, %v542_v19  ;;  %v565_v46 = vadd.f32 %v564_v36, %v563_v15  ;;  %v578_v47 = vrot.slane %v577_v37, 1 }
 0x1f3   : > { %v557_v32 = vrot.slane %v556_v26, 1  ;;  %v569_v33 = vrot.slane %v568_v27, 2  ;;  %v581_v34 = vrot.slane %v580_v30, 4  ;;  %v722_v7 = vrot.slane %v213_v1, 5 }
 0x1f4   : > { %v627_v41 = vsel %vm618_vm9, %v544_v31, %v626_v38  ;;  %v579_v54 = vadd.f32 %v578_v47, %v577_v37  ;;  %v807_v12 = vrot.slane %v213_v1, 1 }
 0x1f5   : > { %v570_v39 = vadd.f32 %v569_v33, %v568_v27  ;;  %v582_v40 = vadd.f32 %v581_v34, %v580_v30  ;;  %v558_v42 = vadd.f32 %v557_v32, %v556_v26  ;;  %v628_v43 = vsel %vm620_vm10, %v551_v35, %v627_v41 }
 0x1f6   : > { %999 = vmatmul.mubr.msk.f32.gmra.mrb[2].mxu0 %vm439_vm3, %v628_v43  ;;  %v723_v10 = vsel %vm720_vm11, %v721_v6, %v722_v7 }
 0x1f7   : > { %v571_v44 = vrot.slane %v570_v39, 1  ;;  %v583_v45 = vrot.slane %v582_v40, 2  ;;  %1001 = vmatprep.mubr.msk.f32.mxu0 %vm1060_vm2, %v1061_v11  ;;  %v629_v51 = vsel %vm608_vm4, %v565_v46, %v558_v42 }
 0x1f9   : > { %v572_v48 = vadd.f32 %v571_v44, %v570_v39  ;;  %v584_v49 = vadd.f32 %v583_v45, %v582_v40 }
 0x1fb   : > { %v585_v52 = vrot.slane %v584_v49, 1  ;;  %v630_v53 = vsel %vm610_vm5, %v572_v48, %v629_v51 }
 0x1fc   : > { %v631_v56 = vsel %vm612_vm6, %v579_v54, %v630_v53 }
 0x1fd   : > { %v586_v55 = vadd.f32 %v585_v52, %v584_v49 }
 0x1ff   : > { %v632_v57 = vsel %vm614_vm7, %v586_v55, %v631_v56 }
 0x200   : > { %1002 = vmatmul.mubr.msk.f32.gmra.mrb[4].mxu0 %vm439_vm3, %v632_v57 }
 0x2bf   : > { %v705_v58 = vpop.f32.mrb[0].mxu0 }
 0x2c0   : > { %v997_v59 = vpop.f32.mrb[1].mxu0  ;;  %v727_v61 = vrot.slane %v705_v58, 5 }
 0x2c9   : > { %v710_v60 = vpop.f32.mrb[2].mxu0 }
 0x2ca   : > { %v728_v62 = vrot.slane %v710_v60, 5  ;;  %v1000_v63 = vpop.f32.mrb[3].mxu0 }
 0x2cc   : > { %v729_v0 = vsel %vm720_vm11, %v727_v61, %v728_v62 }
 0x2d3   : > { %v715_v3 = vpop.f32.mrb[4].mxu0 }
 0x2d4   : > { %v730_v4 = vrot.slane %v715_v3, 5  ;;  %v1003_v5 = vpop.f32.mrb[5].mxu0 }
 0x2d6   : > { %v731_v8 = vsel %vm720_vm11, %v728_v62, %v730_v4 }
 0x2d7   : > { %v1023_v9 = vpack.c.bf16 %v731_v8, %v729_v0 }
 0x2d9   : > { %1024 = vmatpush3.bf16.msra.mxu1 %v1023_v9 }
 0x2da   : > { %1011 = vmatprep.subr.mxu1 %v1061_v11 }
 0x2dc   : > { %1009 = vmatmul.mubr.msk.f32.vlgmr.msra.gmra.mrb[0].mxu1 %vm734_vm12, %v723_v10 }
 0x2dd   : > { %1013 = vmatprep.mubr.msk.f32.mxu1 %vm1060_vm2, %v1061_v11 }
 0x3af   : > { %v803_v13 = vpop.f32.mrb[0].mxu1 }
 0x3b0   : > { %v1010_v14 = vpop.f32.mrb[1].mxu1  ;;  %1012 = vmatpush3.msk.msra.mxu1 %vm811_vm13, %v803_v13 }
 0x3b1   : > { %1014 = vmatmul.mubr.msk.f32.vlgmr.msra.gmra.mrb[2].mxu1 %vm808_vm14, %v807_v12 }
 0x484   : > { %v881_v2 = vpop.f32.mrb[2].mxu1 }
 0x485   : > { %v885_v16 = vmul.f32 %v881_v2, %v705_v58  ;;  %v1015_v50 = vpop.f32.mrb[3].mxu1 }
 0x487   : > { %v887_v17 = vsel %vm886_vm15, %v885_v16, 0.0 }
 0x488   : > { %888 = vadd.xlane.f32.xlu0 %v887_v17 }
 0x515   : > { %v889_v11 = vpop.xlane.xlu0 %888 }
 0x516   : > { %891 = vst.msk [vmem:[%s188_s7] sm:$0x1f] %vm890_vm0, %v889_v11 }
 0x517 PF: > { %s13_s12 = sadd.s32 1, %s1056_s12  }
 0x518   : > { %p10_p4 = scmp.ge.s32.totalorder %s13_s12, 4  }
 0x51a   :  { %12 = sbr.rel (!%p10_p4) target bundleno = 1 (0x1), region = 65 }

</bundles_post_ra>
